<compile_context>
chip_gen: v7x
topology: tpu7x:2x2x1
jax: 0.10.0
libtpu: 0.0.40
codegen_flags: <defaults>
</compile_context>

<pallas_src>
import functools

import jax
import jax.numpy as jnp
from jax.experimental import pallas as pl
from jax.experimental.pallas import tpu as pltpu


def _detect_tile_budget_bytes():
    kind = ""
    try:
        kind = jax.devices()[0].device_kind.lower()
    except Exception:
        pass
    if "v5 lite" in kind or "v5lite" in kind or "v5e" in kind:
        return 2 << 20      # v5e: lower HBM BW + 16 MiB scoped default -> conservative
    return 4 << 20          # v6e / v7x: bigger tiles amortize ~0.35 us per-step overhead


_TILE_BUDGET_BYTES = _detect_tile_budget_bytes()
_VMEM_LIMIT_BYTES = 32 << 20   # 4 x (4 MiB tile) double-buffered in+out, with headroom
_LANE_TILE = 2048              # 128-multiple; lane-density benefit plateaus past ~1-4K


# ----------------------------------------------------------------------------
# Pallas kernel:  out = fv * (ft + 1)   (grouped 1-tap conv1d + residual, fused)
# ----------------------------------------------------------------------------
def _refine_kernel(fv_ref, ft_ref, o_ref):
    # (tr, 1) per-channel scale; the +1 folds in the residual add and is done in
    # f32 on the tiny scale tile (negligible VPU work vs the full-tile multiply).
    kp1 = ft_ref[...] + 1.0
    o_ref[...] = (fv_ref[...] * kp1).astype(o_ref.dtype)


def _pallas_refine_2d(x, k):
    """x: (R, S) flattened visible features, k: (R, 1) f32 per-row scale."""
    R, S = x.shape
    itemsize = x.dtype.itemsize
    sub = {4: 8, 2: 16, 1: 32}.get(itemsize, 8)   # native sublane multiple per dtype

    # Lane (last) dim: full spatial extent when modest (one unmasked lane-dense
    # slab), otherwise 128-aligned chunks with a ragged boundary block.
    tc = S if S <= _LANE_TILE else _LANE_TILE

    # Sublane (row) dim: as many rows as fit the per-tile byte budget.
    tr = max(sub, (_TILE_BUDGET_BYTES // max(tc * itemsize, 1)) // sub * sub)
    if tr >= R:
        if R > 2 * sub and R * tc * itemsize > (1 << 20):
            # Keep >=2 row blocks so both v7x TensorCores get sharded work.
            tr = pl.cdiv(pl.cdiv(R, 2), sub) * sub
        else:
            tr = R                                  # single full-extent block (legal)

    grid = (pl.cdiv(R, tr), pl.cdiv(S, tc))
    return pl.pallas_call(
        _refine_kernel,
        out_shape=jax.ShapeDtypeStruct((R, S), x.dtype),
        grid_spec=pltpu.PrefetchScalarGridSpec(
            num_scalar_prefetch=0,
            grid=grid,
            in_specs=[pl.BlockSpec((tr, tc), lambda i, j: (i, j)),
                      pl.BlockSpec((tr, 1), lambda i, j: (i, 0))],
            out_specs=pl.BlockSpec((tr, tc), lambda i, j: (i, j))),
        compiler_params=pltpu.CompilerParams(
            dimension_semantics=("parallel", "parallel"),
            vmem_limit_bytes=_VMEM_LIMIT_BYTES),
    )(x, k)


@functools.partial(jax.jit, static_argnames=("refine",))
def visual_refinement_forward(fv, ft, refine=True):
    """fv: (b, c, h, w) visible features.
    ft: thermal feature with exactly b*c elements ((b, c), (b, c, 1), or
        (b, c, 1, 1)); the reference's kernel.view(b*c, 1, 1) requires this.
    """
    if not refine:
        return fv                                    # passthrough, no kernel launch
    b, c, h, w = fv.shape
    kvec = ft.reshape(b * c, 1).astype(jnp.float32)  # keep the scale in f32
    x = fv.reshape(b * c, h * w)                     # layout view, no HBM copy
    out = _pallas_refine_2d(x, kvec)
    return out.reshape(b, c, h, w)


# ----------------------------------------------------------------------------
if __name__ == "__main__":
    key = jax.random.PRNGKey(0)
    k1, k2, k3, k4 = jax.random.split(key, 4)

    # Shapes implied by the module: fv (b, c, h, w), ft with b*c elements.
    b, c, h, w = 2, 4, 16, 16
    fv = jax.random.normal(k1, (b, c, h, w), jnp.float32)
    ft = jax.random.normal(k2, (b, c), jnp.float32)

    out = jax.block_until_ready(visual_refinement_forward(fv, ft, refine=True))
    ref = fv * ft[:, :, None, None] + fv      # 1-tap grouped conv1d + residual
    assert out.shape == (b, c, h, w)
    assert bool(jnp.all(jnp.isfinite(out)))
    assert jnp.allclose(out, ref, atol=1e-5, rtol=1e-5)

    # Non-tile-aligned spatial extent (S = 2500 > 2048) exercises the cdiv
    # ragged-boundary path that replaced the old pad/slice round-trips.
    b2, c2, h2, w2 = 3, 8, 50, 50
    fv2 = jax.random.normal(k3, (b2, c2, h2, w2), jnp.float32)
    ft2 = jax.random.normal(k4, (b2, c2), jnp.float32)
    out2 = jax.block_until_ready(visual_refinement_forward(fv2, ft2, refine=True))
    ref2 = fv2 * ft2[:, :, None, None] + fv2
    assert jnp.allclose(out2, ref2, atol=1e-5, rtol=1e-5)

    # refine=False path returns fv unchanged (no kernel launch).
    same = jax.block_until_ready(visual_refinement_forward(fv, ft, refine=False))
    assert jnp.allclose(same, fv)

    print("KERNEL_OK")
</pallas_src>

<mosaic_0001>
module attributes {stable_mosaic.version = 11 : i64} {
  func.func @_refine_kernel(%arg0: i32, %arg1: i32, %arg2: memref<8x256xf32, #tpu.memory_space<vmem>>, %arg3: memref<8x1xf32, #tpu.memory_space<vmem>>, %arg4: memref<8x256xf32, #tpu.memory_space<vmem>>) attributes {dimension_semantics = [#tpu.dimension_semantics<parallel>, #tpu.dimension_semantics<parallel>], iteration_bounds = array<i64: 1, 1>, scalar_prefetch = 0 : i64, scratch_operands = 0 : i64, tpu.core_type = #tpu.core_type<tc>, window_params = [{transform_indices = @transform_0, window_bounds = array<i64: 8, 256>}, {transform_indices = @transform_1, window_bounds = array<i64: 8, 1>}, {transform_indices = @transform_2, window_bounds = array<i64: 8, 256>}]} {
    %c0 = arith.constant 0 : index
    %c0_0 = arith.constant 0 : index
    %0 = vector.load %arg3[%c0, %c0_0] : memref<8x1xf32, #tpu.memory_space<vmem>>, vector<8x1xf32>
    %cst = arith.constant 1.000000e+00 : f32
    %1 = vector.broadcast %cst : f32 to vector<8x1xf32>
    %2 = arith.addf %0, %1 : vector<8x1xf32>
    %c0_1 = arith.constant 0 : index
    %c0_2 = arith.constant 0 : index
    %3 = vector.load %arg2[%c0_1, %c0_2] : memref<8x256xf32, #tpu.memory_space<vmem>>, vector<8x256xf32>
    %4 = vector.broadcast %2 : vector<8x1xf32> to vector<8x256xf32>
    %5 = arith.mulf %3, %4 : vector<8x256xf32>
    %c0_3 = arith.constant 0 : index
    %c0_4 = arith.constant 0 : index
    %6 = vector.load %arg4[%c0_3, %c0_4] : memref<8x256xf32, #tpu.memory_space<vmem>>, vector<8x256xf32>
    tpu.vector_store %arg4[%c0_3, %c0_4], %5 {strides = array<i32>} : memref<8x256xf32, #tpu.memory_space<vmem>>, vector<8x256xf32>,
    return
  }
  func.func @transform_0(%arg0: i32, %arg1: i32) -> (i32, i32) {
    %c0_i32 = arith.constant 0 : i32
    return %arg0, %arg1 : i32, i32
  }
  func.func @transform_1(%arg0: i32, %arg1: i32) -> (i32, i32) {
    %c0_i32 = arith.constant 0 : i32
    %c0_i32_0 = arith.constant 0 : i32
    return %arg0, %c0_i32 : i32, i32
  }
  func.func @transform_2(%arg0: i32, %arg1: i32) -> (i32, i32) {
    %c0_i32 = arith.constant 0 : i32
    return %arg0, %arg1 : i32, i32
  }
}

</mosaic_0001>

<bundles_post_ra>
// kernel: visual_refinement_forward.1
= control target key start
LH: loop header
LB: loop body
LE: loop exit
PB: predicated region body
PF: predicated region fallthrough
CT: control target
= control target key end

     0   :  { %v30_v0 = vmov 0   ;;  %s61_s1 = inlined_call_operand.vmem [shape: f32[8,1], index: 1, kind: input, shape index: {}]   ;;  %s62_s0 = inlined_call_operand.vmem [shape: f32[8,256], index: 0, kind: input, shape index: {}]   ;;  %s63_s2 = inlined_call_operand.vmem [shape: f32[8,256], index: 2, kind: output, shape index: {}]  }
   0x1   :  { %29 = vset.pattern.permute.xlu0 %v30_v0  ;;  %v11_v1 = vld [vmem:[%s61_s1] sm:$0xff]  ;;  %v14_v4 = vld [vmem:[%s62_s0 + $0x8] sm:$0xff] }
   0x2   :  { %v12_v2 = vadd.f32 1.0, %v11_v1  ;;  %v13_v3 = vld [vmem:[%s62_s0] sm:$0xff] }
   0x4   :  { %17 = vperm.xlu0 %29, %v12_v2  }
  0x83   :  { %v18_v5 = vpop.permute.xlu0 %17 }
  0x84   :  { %v20_v6 = vmul.f32 %v18_v5, %v13_v3  ;;  %v21_v7 = vmul.f32 %v18_v5, %v14_v4 }
  0x86   :  { %22 = vst [vmem:[%s63_s2] sm:$0xff] %v20_v6  ;;  %23 = vst [vmem:[%s63_s2 + $0x8] sm:$0xff] %v21_v7 }

</bundles_post_ra>
